<compile_context>
chip_gen: v5e
topology: v5e:2x2
jax: 0.10.0
libtpu: 0.0.40
codegen_flags: <defaults>
</compile_context>

<pallas_src>
import functools

import jax
import jax.numpy as jnp
from jax.experimental import pallas as pl
from jax.experimental.pallas import tpu as pltpu


def _round_up(x, m):
    return (x + m - 1) // m * m


def _make_act(name):
    return {
        'relu': lambda v: jnp.maximum(v, 0.0),
        'tanh': jnp.tanh,
        'sigmoid': jax.nn.sigmoid,
        'elu': jax.nn.elu,
        'linear': lambda v: v,
    }[name]


# ----------------------------------------------------------------------------
# One-time parameter preprocessing (outside jit):
#  - fold conv(k=1) + NCW flatten into the first Linear weight,
#  - fuse mean/log_var head,
#  - zero-pad everything to (8,128)-aligned shapes,
#  - cast weights to bf16 (biases stay f32),
#  - pick the layer-0 K tile so each streamed weight tile is multi-MB.
# ----------------------------------------------------------------------------
def fold_params(params, seq_len, convolve_input=True, *,
                tk_target_bytes=4 * 1024 * 1024):
    w1 = params['hidden_ws'][0].astype(jnp.float32)    # (C*L, H1), row = c*L+l
    b1 = params['hidden_bs'][0].astype(jnp.float32)    # (1, H1)
    if convolve_input:
        w_conv = params['w_conv']                      # (A, C) = torch W[:,:,0].T
        A, C = w_conv.shape
        L = seq_len
        H1 = w1.shape[1]
        w1_r = w1.reshape(C, L, H1)
        # W_eff[(l, a), j] = sum_c w_conv[a, c] * W1[c*L + l, j]
        w0 = jnp.einsum('ac,clh->lah', w_conv, w1_r).reshape(L * A, H1)
    else:
        w0 = w1

    K, H1 = w0.shape
    H1p = _round_up(H1, 128)

    # Choose the layer-0 K tile (multiple of 128 so the x tile is lane-aligned).
    k_full = _round_up(K, 128)
    if k_full * H1p * 2 <= 2 * tk_target_bytes:        # small layer: one step
        tk = k_full
    else:
        tk = max(128, (tk_target_bytes // (H1p * 2)) // 128 * 128)
        tk = min(tk, k_full)
    Kp = _round_up(K, tk)

    w0_p = jnp.pad(w0, ((0, Kp - K), (0, H1p - H1))).astype(jnp.bfloat16)
    b0_p = jnp.pad(b1, ((0, 0), (0, H1p - H1)))         # f32

    ws_rest, bs_rest = [], []
    prev_p = H1p
    for w, b in zip(params['hidden_ws'][1:], params['hidden_bs'][1:]):
        d_in, d_out = w.shape
        d_out_p = _round_up(d_out, 128)
        ws_rest.append(jnp.pad(w, ((0, prev_p - d_in), (0, d_out_p - d_out)))
                       .astype(jnp.bfloat16))
        bs_rest.append(jnp.pad(b, ((0, 0), (0, d_out_p - d_out))))
        prev_p = d_out_p

    z_dim = int(params['w_mu'].shape[1])
    w_head = jnp.concatenate([params['w_mu'], params['w_lv']], axis=1)
    b_head = jnp.concatenate([params['b_mu'], params['b_lv']], axis=1)
    n_head = 2 * z_dim
    n_head_p = _round_up(n_head, 128)
    w_head = jnp.pad(w_head, ((0, prev_p - w_head.shape[0]),
                              (0, n_head_p - n_head))).astype(jnp.bfloat16)
    b_head = jnp.pad(b_head, ((0, 0), (0, n_head_p - n_head)))

    folded = {
        'w0': w0_p, 'b0': b0_p,
        'ws_rest': tuple(ws_rest), 'bs_rest': tuple(bs_rest),
        'w_head': w_head, 'b_head': b_head,
    }
    meta = {'tk': int(tk), 'z_dim': z_dim, 'k_in': int(K)}
    return folded, meta


# ----------------------------------------------------------------------------
# Fused encoder kernel:
#   grid=(Kp//tk,) over layer-0's reduction axis.
#   k==0   : accumulator initialized with the layer-0 bias (folded init).
#   every k: acc += x_tile(bf16) @ w0_tile(bf16)  (f32 accumulate, MXU).
#   k==last: activation + remaining hidden layers + fused mean|log_var head,
#            all on resident whole-block VMEM weights.
# ----------------------------------------------------------------------------
def _make_encoder_kernel(n_rest, act):
    def kernel(*refs):
        x_ref, w0_ref, b0_ref = refs[0], refs[1], refs[2]
        tail_refs = refs[3:-2]            # [w_i, b_i]*n_rest, w_head, b_head
        o_ref, acc_ref = refs[-2], refs[-1]
        k = pl.program_id(0)

        @pl.when(k == 0)
        def _():
            acc_ref[...] = jnp.broadcast_to(b0_ref[...], acc_ref.shape)

        acc_ref[...] += jnp.dot(x_ref[...].astype(jnp.bfloat16), w0_ref[...],
                                preferred_element_type=jnp.float32)

        @pl.when(k == pl.num_programs(0) - 1)
        def _():
            h = act(acc_ref[...])
            idx = 0
            for _ in range(n_rest):
                w = tail_refs[idx][...]
                b = tail_refs[idx + 1][...]
                idx += 2
                h = act(jnp.dot(h.astype(jnp.bfloat16), w,
                                preferred_element_type=jnp.float32) + b)
            w_head = tail_refs[idx][...]
            b_head = tail_refs[idx + 1][...]
            o_ref[...] = jnp.dot(h.astype(jnp.bfloat16), w_head,
                                 preferred_element_type=jnp.float32) + b_head
    return kernel


def _encoder_pallas(x, folded, *, activation, tk):
    Bp, Kp = x.shape
    H1p = folded['w0'].shape[1]
    n_head_p = folded['w_head'].shape[1]
    n_rest = len(folded['ws_rest'])

    args = [x, folded['w0'], folded['b0']]
    in_specs = [
        pl.BlockSpec((Bp, tk), lambda k: (0, k)),        # x K-tiles
        pl.BlockSpec((tk, H1p), lambda k: (k, 0)),       # w0 K-tiles (streamed)
        pl.BlockSpec((1, H1p), lambda k: (0, 0)),        # b0 (resident)
    ]
    tail_pairs = list(zip(folded['ws_rest'], folded['bs_rest']))
    tail_pairs.append((folded['w_head'], folded['b_head']))
    for w, b in tail_pairs:
        args += [w, b]
        in_specs += [pl.BlockSpec(tuple(w.shape), lambda k: (0, 0)),
                     pl.BlockSpec(tuple(b.shape), lambda k: (0, 0))]

    n_k = Kp // tk

    # VMEM budget: double-buffered BlockSpec inputs + f32 accumulator + output.
    vmem = 2 * Bp * tk * 4 + 2 * tk * H1p * 2 + 2 * H1p * 4
    vmem += Bp * H1p * 4
    vmem += 2 * Bp * n_head_p * 4
    for w, b in tail_pairs:
        vmem += 2 * (int(w.size) * 2 + int(b.size) * 4)
    vmem_limit = min(int(vmem) + (8 << 20), 112 * 1024 * 1024)

    # Cost estimate: each weight byte streamed once; x read once; out written once.
    flops = 2 * Bp * Kp * H1p
    bytes_accessed = Bp * Kp * 4 + Kp * H1p * 2 + H1p * 4
    for w, b in tail_pairs:
        flops += 2 * Bp * int(w.shape[0]) * int(w.shape[1])
        bytes_accessed += int(w.size) * 2 + int(b.size) * 4
    bytes_accessed += Bp * n_head_p * 4
    trans_per_elem = 1 if activation in ('tanh', 'sigmoid', 'elu') else 0
    n_act_elems = Bp * (H1p + sum(int(w.shape[1]) for w in folded['ws_rest']))
    cost = pl.CostEstimate(flops=int(flops),
                           transcendentals=int(trans_per_elem * n_act_elems),
                           bytes_accessed=int(bytes_accessed))

    kernel = _make_encoder_kernel(n_rest, _make_act(activation))
    return pl.pallas_call(
        kernel,
        out_shape=jax.ShapeDtypeStruct((Bp, n_head_p), jnp.float32),
        grid_spec=pltpu.PrefetchScalarGridSpec(
            num_scalar_prefetch=0,
            grid=(n_k,),
            in_specs=in_specs,
            out_specs=pl.BlockSpec((Bp, n_head_p), lambda k: (0, 0)),
            scratch_shapes=[pltpu.VMEM((Bp, H1p), jnp.float32)]),
        compiler_params=pltpu.CompilerParams(
            dimension_semantics=("arbitrary",),
            vmem_limit_bytes=vmem_limit),
        cost_estimate=cost,
    )(*args)


# ----------------------------------------------------------------------------
# Full encoder forward (matches VAE_MLP_encoder.forward, eval mode)
# ----------------------------------------------------------------------------
@functools.partial(jax.jit, static_argnames=('activation', 'z_dim', 'tk'))
def vae_mlp_encoder_forward(x, folded, *, activation='relu', z_dim, tk):
    """x: (B, seq_len, alphabet_size) float32."""
    B, L, A = x.shape
    K = L * A
    Kp = folded['w0'].shape[0]
    Bp = _round_up(max(B, 8), 8)            # f32 sublane tile
    h = x.reshape(B, K)
    # Only the (small) activation is padded inside jit; weights are pre-padded.
    h = jnp.pad(h, ((0, Bp - B), (0, Kp - K)))
    out = _encoder_pallas(h, folded, activation=activation, tk=tk)
    z_mean = out[:B, :z_dim]
    z_log_var = out[:B, z_dim:2 * z_dim]
    return z_mean, z_log_var


# ----------------------------------------------------------------------------
# Deterministic parameter construction (mirrors __init__ shapes / bias init)
# ----------------------------------------------------------------------------
def make_params(key, seq_len, alphabet_size, conv_depth, hidden_sizes, z_dim,
                convolve_input=True):
    mu_bias_init = 0.1
    log_var_bias_init = -10.0
    channel_size = conv_depth if convolve_input else alphabet_size

    keys = jax.random.split(key, 3 + len(hidden_sizes))
    params = {}
    # Conv1d(alphabet_size, conv_depth, kernel=1, bias=False); weight[:,:,0].T
    params['w_conv'] = (jax.random.normal(keys[0], (alphabet_size, conv_depth),
                                          jnp.float32) * 0.1)

    hidden_ws, hidden_bs = [], []
    in_dim = channel_size * seq_len
    for i, h_dim in enumerate(hidden_sizes):
        w = jax.random.normal(keys[1 + i], (in_dim, h_dim), jnp.float32) * 0.05
        bias = jnp.full((1, h_dim), mu_bias_init, jnp.float32)
        hidden_ws.append(w)
        hidden_bs.append(bias)
        in_dim = h_dim
    params['hidden_ws'] = tuple(hidden_ws)
    params['hidden_bs'] = tuple(hidden_bs)

    params['w_mu'] = jax.random.normal(keys[-2], (in_dim, z_dim),
                                       jnp.float32) * 0.05
    params['b_mu'] = jnp.full((1, z_dim), mu_bias_init, jnp.float32)
    params['w_lv'] = jax.random.normal(keys[-1], (in_dim, z_dim),
                                       jnp.float32) * 0.05
    params['b_lv'] = jnp.full((1, z_dim), log_var_bias_init, jnp.float32)
    return params


# Pure-JAX f32 reference (follows the PyTorch module literally).
def reference_forward(x, params, activation='relu'):
    B, L, A = x.shape
    h = jnp.einsum('bla,ac->blc', x, params['w_conv'])        # conv1d k=1
    C = params['w_conv'].shape[1]
    h = jnp.transpose(h, (0, 2, 1)).reshape(B, C * L)          # NCW flatten
    act = _make_act(activation)
    for w, b in zip(params['hidden_ws'], params['hidden_bs']):
        h = act(h @ w + b)
    z_mean = h @ params['w_mu'] + params['b_mu']
    z_log_var = h @ params['w_lv'] + params['b_lv']
    return z_mean, z_log_var


if __name__ == "__main__":
    # Small, module-consistent shapes.
    batch = 4
    seq_len = 16
    alphabet_size = 8
    conv_depth = 8            # convolution_input_depth
    hidden_sizes = [64, 32]   # hidden_layers_sizes
    z_dim = 16
    # dropout_proba = 0.0 -> no dropout applied in forward (eval semantics).

    key = jax.random.PRNGKey(0)
    k_x, k_p = jax.random.split(key)
    x = jax.random.normal(k_x, (batch, seq_len, alphabet_size), jnp.float32)
    params = make_params(k_p, seq_len, alphabet_size, conv_depth,
                         hidden_sizes, z_dim, convolve_input=True)

    # One-time fold: conv+flatten into layer-0 weight, head fusion, padding,
    # bf16 weight cast, K-tile selection.
    folded, meta = fold_params(params, seq_len, convolve_input=True)

    z_mean, z_log_var = vae_mlp_encoder_forward(
        x, folded, activation='relu', z_dim=meta['z_dim'], tk=meta['tk'])
    jax.block_until_ready((z_mean, z_log_var))

    ref_mean, ref_log_var = reference_forward(x, params, activation='relu')
    assert z_mean.shape == (batch, z_dim)
    assert z_log_var.shape == (batch, z_dim)
    # bf16 weights (f32 accumulation) -> looser tolerance than pure f32.
    assert jnp.allclose(z_mean, ref_mean, atol=2e-2, rtol=2e-2)
    assert jnp.allclose(z_log_var, ref_log_var, atol=2e-2, rtol=2e-2)

    print("KERNEL_OK")
</pallas_src>

<mosaic_0001>
module attributes {stable_mosaic.version = 11 : i64} {
  func.func @kernel(%arg0: i32, %arg1: memref<8x128xf32, #tpu.memory_space<vmem>>, %arg2: memref<128x128xbf16, #tpu.memory_space<vmem>>, %arg3: memref<1x128xf32, #tpu.memory_space<vmem>>, %arg4: memref<128x128xbf16, #tpu.memory_space<vmem>>, %arg5: memref<1x128xf32, #tpu.memory_space<vmem>>, %arg6: memref<128x128xbf16, #tpu.memory_space<vmem>>, %arg7: memref<1x128xf32, #tpu.memory_space<vmem>>, %arg8: memref<8x128xf32, #tpu.memory_space<vmem>>, %arg9: memref<8x128xf32, #tpu.memory_space<vmem>>) attributes {dimension_semantics = [#tpu.dimension_semantics<arbitrary>], iteration_bounds = array<i64: 1>, scalar_prefetch = 0 : i64, scratch_operands = 1 : i64, tpu.core_type = #tpu.core_type<tc>, window_params = [{transform_indices = @transform_0, window_bounds = array<i64: 8, 128>}, {transform_indices = @transform_1, window_bounds = array<i64: 128, 128>}, {pipeline_mode = #tpu.pipeline_mode<synchronous>, transform_indices = @transform_2, window_bounds = array<i64: 1, 128>}, {pipeline_mode = #tpu.pipeline_mode<synchronous>, transform_indices = @transform_3, window_bounds = array<i64: 128, 128>}, {pipeline_mode = #tpu.pipeline_mode<synchronous>, transform_indices = @transform_4, window_bounds = array<i64: 1, 128>}, {pipeline_mode = #tpu.pipeline_mode<synchronous>, transform_indices = @transform_5, window_bounds = array<i64: 128, 128>}, {pipeline_mode = #tpu.pipeline_mode<synchronous>, transform_indices = @transform_6, window_bounds = array<i64: 1, 128>}, {pipeline_mode = #tpu.pipeline_mode<synchronous>, transform_indices = @transform_7, window_bounds = array<i64: 8, 128>}]} {
    %c0_i32 = arith.constant 0 : i32
    %0 = arith.cmpi eq, %arg0, %c0_i32 : i32
    %1 = arith.extui %0 : i1 to i32
    %c0_i32_0 = arith.constant 0 : i32
    %2 = arith.cmpi ne, %1, %c0_i32_0 : i32
    scf.if %2 {
      %c0_10 = arith.constant 0 : index
      %c0_11 = arith.constant 0 : index
      %13 = vector.load %arg3[%c0_10, %c0_11] : memref<1x128xf32, #tpu.memory_space<vmem>>, vector<1x128xf32>
      %14 = vector.shape_cast %13 : vector<1x128xf32> to vector<1x128xf32>
      %15 = vector.broadcast %14 : vector<1x128xf32> to vector<8x128xf32>
      %c0_12 = arith.constant 0 : index
      %c0_13 = arith.constant 0 : index
      %16 = vector.load %arg9[%c0_12, %c0_13] : memref<8x128xf32, #tpu.memory_space<vmem>>, vector<8x128xf32>
      tpu.vector_store %arg9[%c0_12, %c0_13], %15 {strides = array<i32>} : memref<8x128xf32, #tpu.memory_space<vmem>>, vector<8x128xf32>,
    } else {
    }
    %c0 = arith.constant 0 : index
    %c0_1 = arith.constant 0 : index
    %3 = vector.load %arg9[%c0, %c0_1] : memref<8x128xf32, #tpu.memory_space<vmem>>, vector<8x128xf32>
    %c0_2 = arith.constant 0 : index
    %c0_3 = arith.constant 0 : index
    %4 = vector.load %arg1[%c0_2, %c0_3] : memref<8x128xf32, #tpu.memory_space<vmem>>, vector<8x128xf32>
    %5 = arith.truncf %4 : vector<8x128xf32> to vector<8x128xbf16>
    %c0_4 = arith.constant 0 : index
    %c0_5 = arith.constant 0 : index
    %6 = vector.load %arg2[%c0_4, %c0_5] : memref<128x128xbf16, #tpu.memory_space<vmem>>, vector<128x128xbf16>
    %cst = arith.constant dense<0.000000e+00> : vector<8x128xf32>
    %7 = tpu.matmul %5, %6, %cst {dimension_numbers = #tpu.dot_dimension_numbers<[1], [0], [0], [1], [0, 0, 1, 1], [], []>} : vector<8x128xbf16>, vector<128x128xbf16>, vector<8x128xf32> -> vector<8x128xf32>
    %8 = arith.addf %3, %7 : vector<8x128xf32>
    %c0_6 = arith.constant 0 : index
    %c0_7 = arith.constant 0 : index
    %9 = vector.load %arg9[%c0_6, %c0_7] : memref<8x128xf32, #tpu.memory_space<vmem>>, vector<8x128xf32>
    tpu.vector_store %arg9[%c0_6, %c0_7], %8 {strides = array<i32>} : memref<8x128xf32, #tpu.memory_space<vmem>>, vector<8x128xf32>,
    %c0_i32_8 = arith.constant 0 : i32
    %10 = arith.cmpi eq, %arg0, %c0_i32_8 : i32
    %11 = arith.extui %10 : i1 to i32
    %c0_i32_9 = arith.constant 0 : i32
    %12 = arith.cmpi ne, %11, %c0_i32_9 : i32
    scf.if %12 {
      %c0_10 = arith.constant 0 : index
      %c0_11 = arith.constant 0 : index
      %13 = vector.load %arg9[%c0_10, %c0_11] : memref<8x128xf32, #tpu.memory_space<vmem>>, vector<8x128xf32>
      %cst_12 = arith.constant 0.000000e+00 : f32
      %14 = vector.broadcast %cst_12 : f32 to vector<8x128xf32>
      %15 = arith.maximumf %13, %14 : vector<8x128xf32>
      %c0_13 = arith.constant 0 : index
      %c0_14 = arith.constant 0 : index
      %16 = vector.load %arg4[%c0_13, %c0_14] : memref<128x128xbf16, #tpu.memory_space<vmem>>, vector<128x128xbf16>
      %c0_15 = arith.constant 0 : index
      %c0_16 = arith.constant 0 : index
      %17 = vector.load %arg5[%c0_15, %c0_16] : memref<1x128xf32, #tpu.memory_space<vmem>>, vector<1x128xf32>
      %18 = arith.truncf %15 : vector<8x128xf32> to vector<8x128xbf16>
      %cst_17 = arith.constant dense<0.000000e+00> : vector<8x128xf32>
      %19 = tpu.matmul %18, %16, %cst_17 {dimension_numbers = #tpu.dot_dimension_numbers<[1], [0], [0], [1], [0, 0, 1, 1], [], []>} : vector<8x128xbf16>, vector<128x128xbf16>, vector<8x128xf32> -> vector<8x128xf32>
      %20 = vector.broadcast %17 : vector<1x128xf32> to vector<8x128xf32>
      %21 = arith.addf %19, %20 : vector<8x128xf32>
      %cst_18 = arith.constant 0.000000e+00 : f32
      %22 = vector.broadcast %cst_18 : f32 to vector<8x128xf32>
      %23 = arith.maximumf %21, %22 : vector<8x128xf32>
      %c0_19 = arith.constant 0 : index
      %c0_20 = arith.constant 0 : index
      %24 = vector.load %arg6[%c0_19, %c0_20] : memref<128x128xbf16, #tpu.memory_space<vmem>>, vector<128x128xbf16>
      %c0_21 = arith.constant 0 : index
      %c0_22 = arith.constant 0 : index
      %25 = vector.load %arg7[%c0_21, %c0_22] : memref<1x128xf32, #tpu.memory_space<vmem>>, vector<1x128xf32>
      %26 = arith.truncf %23 : vector<8x128xf32> to vector<8x128xbf16>
      %cst_23 = arith.constant dense<0.000000e+00> : vector<8x128xf32>
      %27 = tpu.matmul %26, %24, %cst_23 {dimension_numbers = #tpu.dot_dimension_numbers<[1], [0], [0], [1], [0, 0, 1, 1], [], []>} : vector<8x128xbf16>, vector<128x128xbf16>, vector<8x128xf32> -> vector<8x128xf32>
      %28 = vector.broadcast %25 : vector<1x128xf32> to vector<8x128xf32>
      %29 = arith.addf %27, %28 : vector<8x128xf32>
      %c0_24 = arith.constant 0 : index
      %c0_25 = arith.constant 0 : index
      %30 = vector.load %arg8[%c0_24, %c0_25] : memref<8x128xf32, #tpu.memory_space<vmem>>, vector<8x128xf32>
      tpu.vector_store %arg8[%c0_24, %c0_25], %29 {strides = array<i32>} : memref<8x128xf32, #tpu.memory_space<vmem>>, vector<8x128xf32>,
    } else {
    }
    return
  }
  func.func @transform_0(%arg0: i32) -> (i32, i32) {
    %c0_i32 = arith.constant 0 : i32
    %c0_i32_0 = arith.constant 0 : i32
    return %c0_i32, %arg0 : i32, i32
  }
  func.func @transform_1(%arg0: i32) -> (i32, i32) {
    %c0_i32 = arith.constant 0 : i32
    %c0_i32_0 = arith.constant 0 : i32
    return %arg0, %c0_i32 : i32, i32
  }
  func.func @transform_2(%arg0: i32) -> (i32, i32) {
    %c0_i32 = arith.constant 0 : i32
    %c0_i32_0 = arith.constant 0 : i32
    %c0_i32_1 = arith.constant 0 : i32
    return %c0_i32, %c0_i32_0 : i32, i32
  }
  func.func @transform_3(%arg0: i32) -> (i32, i32) {
    %c0_i32 = arith.constant 0 : i32
    %c0_i32_0 = arith.constant 0 : i32
    %c0_i32_1 = arith.constant 0 : i32
    return %c0_i32, %c0_i32_0 : i32, i32
  }
  func.func @transform_4(%arg0: i32) -> (i32, i32) {
    %c0_i32 = arith.constant 0 : i32
    %c0_i32_0 = arith.constant 0 : i32
    %c0_i32_1 = arith.constant 0 : i32
    return %c0_i32, %c0_i32_0 : i32, i32
  }
  func.func @transform_5(%arg0: i32) -> (i32, i32) {
    %c0_i32 = arith.constant 0 : i32
    %c0_i32_0 = arith.constant 0 : i32
    %c0_i32_1 = arith.constant 0 : i32
    return %c0_i32, %c0_i32_0 : i32, i32
  }
  func.func @transform_6(%arg0: i32) -> (i32, i32) {
    %c0_i32 = arith.constant 0 : i32
    %c0_i32_0 = arith.constant 0 : i32
    %c0_i32_1 = arith.constant 0 : i32
    return %c0_i32, %c0_i32_0 : i32, i32
  }
  func.func @transform_7(%arg0: i32) -> (i32, i32) {
    %c0_i32 = arith.constant 0 : i32
    %c0_i32_0 = arith.constant 0 : i32
    %c0_i32_1 = arith.constant 0 : i32
    return %c0_i32, %c0_i32_0 : i32, i32
  }
}

</mosaic_0001>

<bundles_post_ra>
// kernel: vae_mlp_encoder_forward.1
= control target key start
LH: loop header
LB: loop body
LE: loop exit
PB: predicated region body
PF: predicated region fallthrough
CT: control target
= control target key end

     0   :  { %12 = vsyncpa [#allocation4], 0  ;;  %s461_s27 = smov [#allocation3]   ;;  %s462_s29 = smov 64   ;;  %s570_s0 = inlined_call_operand.vmem [shape: f32[8,128], index: 0, kind: input, shape index: {}]   ;;  %s571_s1 = inlined_call_operand.vmem [shape: bf16[128,128], index: 1, kind: input, shape index: {}]   ;;  %s572_s2 = inlined_call_operand.vmem [shape: f32[1,128], index: 2, kind: input, shape index: {}]   ;;  %s573_s3 = inlined_call_operand.vmem [shape: bf16[128,128], index: 3, kind: input, shape index: {}]   ;;  %s574_s4 = inlined_call_operand.vmem [shape: f32[1,128], index: 4, kind: input, shape index: {}]   ;;  %s575_s5 = inlined_call_operand.hbm [shape: bf16[128,128], index: 5, kind: input, shape index: {}]   ;;  %s576_s6 = inlined_call_operand.vmem [shape: f32[1,128], index: 6, kind: input, shape index: {}]   ;;  %s577_s7 = inlined_call_operand.vmem [shape: f32[8,128], index: 7, kind: output, shape index: {}]  }
   0x1   :  { %s27_s26 = sshll.u32 %s575_s5, 4  ;;  %s29_s28 = sshll.u32 %s461_s27, 4  ;;  %s28_s26 = int_to_ptr.hbm [resolvable:$true] %s27_s26  ;;  %s30_s28 = int_to_ptr.vmem [resolvable:$true] %s29_s28 }
   0x2   :  { %s463_s30 = smov 4  }
   0x3   :  { %35 = dma.hbm_to_vmem [thread:$0]  %s28_s26, 1024, %s30_s28, [#allocation4], %s462_s29, %s462_s29, %s463_s30  }
   0x4   :  { %459 = dma.done.wait [#allocation4], 1024  }
   0x5   :  { %460 = vsyncadd [#allocation4], 4294966272  ;;  %v412_v0 = vld [vmem:[%s571_s1 + $0x38] sm:$0xff]  ;;  %v411_v1 = vld [vmem:[%s571_s1 + $0x30] sm:$0xff] }
   0x6   :  { %118 = vmatpush.bf16.msra.mxu0 %v412_v0  ;;  %v420_v2 = vld [vmem:[%s573_s3 + $0x38] sm:$0xff]  ;;  %v419_v3 = vld [vmem:[%s573_s3 + $0x30] sm:$0xff]  ;;  %v410_v4 = vld [vmem:[%s571_s1 + $0x28] sm:$0xff] }
   0x7   :  { %207 = vmatpush.bf16.msra.mxu1 %v420_v2  ;;  %v418_v5 = vld [vmem:[%s573_s3 + $0x28] sm:$0xff]  ;;  %v409_v6 = vld [vmem:[%s571_s1 + $0x20] sm:$0xff]  ;;  %v408_v8 = vld [vmem:[%s571_s1 + $0x18] sm:$0xff] }
   0x8   :  { %v417_v7 = vld [vmem:[%s573_s3 + $0x20] sm:$0xff]  ;;  %v416_v9 = vld [vmem:[%s573_s3 + $0x18] sm:$0xff]  ;;  %v407_v10 = vld [vmem:[%s571_s1 + $0x10] sm:$0xff] }
   0x9   :  { %v415_v11 = vld [vmem:[%s573_s3 + $0x10] sm:$0xff]  ;;  %v406_v12 = vld [vmem:[%s571_s1 + $0x8] sm:$0xff]  ;;  %v405_v13 = vld [vmem:[%s571_s1] sm:$0xff] }
   0xa   :  { %119 = vmatpush.bf16.msra.mxu0 %v411_v1  ;;  %v52_v14 = vld [vmem:[%s570_s0] sm:$0xff]  ;;  %v414_v16 = vld [vmem:[%s573_s3 + $0x8] sm:$0xff]  ;;  %v428_v18 = vld [vmem:[#allocation3 + $0x38] sm:$0xff] }
   0xb   :  { %208 = vmatpush.bf16.msra.mxu1 %v419_v3  ;;  %v53_v15 = vpack.c.bf16 %v52_v14, %v52_v14  ;;  %v413_v17 = vld [vmem:[%s573_s3] sm:$0xff]  ;;  %290 = vmatpush.bf16.msra.mxu2 %v428_v18  ;;  %v427_v19 = vld [vmem:[#allocation3 + $0x30] sm:$0xff]  ;;  %v426_v20 = vld [vmem:[#allocation3 + $0x28] sm:$0xff] }
   0xc   :  { %v425_v21 = vld [vmem:[#allocation3 + $0x20] sm:$0xff]  ;;  %v424_v22 = vld [vmem:[#allocation3 + $0x18] sm:$0xff]  ;;  %v423_v23 = vld [vmem:[#allocation3 + $0x10] sm:$0xff] }
   0xd   :  { %v432_v24 = vld [vmem:[%s572_s2] ss:$0 sm:$0xff]  ;;  %v422_v30 = vld [vmem:[#allocation3 + $0x8] sm:$0xff] }
   0xe   :  { %120 = vmatpush.bf16.msra.mxu0 %v410_v4  ;;  %v421_v31 = vld [vmem:[#allocation3] sm:$0xff] }
   0xf   :  { %209 = vmatpush.bf16.msra.mxu1 %v418_v5  ;;  %291 = vmatpush.bf16.msra.mxu2 %v427_v19  ;;  %v433_v32 = vld [vmem:[%s574_s4] ss:$0 sm:$0xff] }
  0x10   :  { %v434_v38 = vld [vmem:[%s576_s6] ss:$0 sm:$0xff] }
  0x12   :  { %121 = vmatpush.bf16.msra.mxu0 %v409_v6 }
  0x13   :  { %210 = vmatpush.bf16.msra.mxu1 %v417_v7  ;;  %292 = vmatpush.bf16.msra.mxu2 %v426_v20 }
  0x16   :  { %122 = vmatpush.bf16.msra.mxu0 %v408_v8 }
  0x17   :  { %211 = vmatpush.bf16.msra.mxu1 %v416_v9  ;;  %293 = vmatpush.bf16.msra.mxu2 %v425_v21 }
  0x1a   :  { %123 = vmatpush.bf16.msra.mxu0 %v407_v10 }
  0x1b   :  { %212 = vmatpush.bf16.msra.mxu1 %v415_v11  ;;  %294 = vmatpush.bf16.msra.mxu2 %v424_v22 }
  0x1e   :  { %124 = vmatpush.bf16.msra.mxu0 %v406_v12 }
  0x1f   :  { %213 = vmatpush.bf16.msra.mxu1 %v414_v16  ;;  %295 = vmatpush.bf16.msra.mxu2 %v423_v23 }
  0x22   :  { %125 = vmatpush.bf16.msra.mxu0 %v405_v13 }
  0x23   :  { %214 = vmatpush.bf16.msra.mxu1 %v413_v17  ;;  %296 = vmatpush.bf16.msra.mxu2 %v422_v30 }
  0x25   :  { %126 = vmatmul.bf16.vlgmr.msra.gmra.mxu0 %v53_v15 }
  0x27   :  { %297 = vmatpush.bf16.msra.mxu2 %v421_v31 }
  0xa2   :  { %v127_v25 = vpop.f32.mrf.mxu0 }
  0xa3   :  { %v131_v26 = vadd.f32 %v432_v24, %v127_v25 }
  0xa5   :  { %v137_v27 = vmax.f32 %v131_v26, 0.0 }
  0xa7   :  { %v155_v28 = vpack.c.bf16 %v137_v27, %v137_v27 }
  0xa9   :  { %215 = vmatmul.bf16.vlgmr.msra.gmra.mxu1 %v155_v28 }
  0xaa   :  { %v129_v29 = vpop.f32.mrf.mxu0 }
 0x126   :  { %v216_v33 = vpop.f32.mrf.mxu1 }
 0x127   :  { %v217_v34 = vadd.f32 %v433_v32, %v216_v33 }
 0x129   :  { %v220_v35 = vmax.f32 %v217_v34, 0.0 }
 0x12b   :  { %v238_v36 = vpack.c.bf16 %v220_v35, %v220_v35 }
 0x12d   :  { %298 = vmatmul.bf16.vlgmr.msra.gmra.mxu2 %v238_v36 }
 0x12e   :  { %v218_v37 = vpop.f32.mrf.mxu1 }
 0x1b0   :  { %v299_v39 = vpop.f32.mrf.mxu2 }
 0x1b1   :  { %v300_v40 = vadd.f32 %v434_v38, %v299_v39 }
 0x1b3   :  { %303 = vst [vmem:[%s577_s7] sm:$0xff] %v300_v40 }
 0x1b8   :  { %v301_v41 = vpop.f32.mrf.mxu2 }
 0x1b9   :  { %308 = vsyncpa [#allocation4], 1 }

</bundles_post_ra>
